<compile_context>
chip_gen: v7x
topology: tpu7x:2x2x1
jax: 0.10.0
libtpu: 0.0.40
codegen_flags: <defaults>
</compile_context>

<pallas_src>
import jax
import jax.numpy as jnp
from jax.experimental import pallas as pl
from jax.experimental.pallas import tpu as pltpu


def actor_kernel(x_ref, w1_ref, b1_ref, w2_ref, b2_ref, out_ref):
    # Hidden layer: (TILE_B, S) @ (S, H) + (1, H) -> ReLU
    x = x_ref[...]
    h = jnp.dot(x, w1_ref[...], preferred_element_type=jnp.float32) + b1_ref[...]
    h = jnp.maximum(h, 0.0)

    # Output layer: (TILE_B, H) @ (H, A_pad) + (1, A_pad)
    # Padded columns carry logit ~ -1e9, so they vanish under the softmax.
    logits = jnp.dot(h, w2_ref[...], preferred_element_type=jnp.float32) + b2_ref[...]

    # Numerically-stable softmax along the lane-dense (multiple-of-128) last axis.
    m = jnp.max(logits, axis=-1, keepdims=True)
    e = jnp.exp(logits - m)
    denom = jnp.sum(e, axis=-1, keepdims=True)
    inv = 1.0 / denom                      # exact: one divide per row
    out_ref[...] = (e * inv).astype(out_ref.dtype)


def prepare_actor_params(w1, b1, w2, b2):
    """One-time padding of the output layer so the kernel's last axis is a
    lane-dense multiple of 128.  Padded w2 columns are 0 and padded b2 entries
    are -1e9, so padded logits vanish under the softmax.  Call once, reuse."""
    action_dim = w2.shape[1]
    a_pad = pl.cdiv(action_dim, 128) * 128
    if a_pad != action_dim:
        w2 = jnp.pad(w2, ((0, 0), (0, a_pad - action_dim)))
        b2 = jnp.pad(b2, ((0, 0), (0, a_pad - action_dim)), constant_values=-1e9)
    return (w1, b1, w2, b2, action_dim)


def _choose_tile_b(batch, max_tile=512):
    # Aim for >= 2 grid steps (v7x megacore), tile a multiple of 8,
    # capped at max_tile, clamped to the full batch for tiny inputs.
    half = -(-batch // 2)
    tile = min(max_tile, max(8, ((half + 7) // 8) * 8))
    if tile >= batch:
        tile = batch              # single full-extent block (always legal)
    return tile


def actor_forward(x, params, *, tile_b=None):
    """x: (B, S) f32; params from prepare_actor_params()."""
    w1, b1, w2p, b2p, action_dim = params
    B, S = x.shape
    H = w1.shape[1]
    a_pad = w2p.shape[1]

    if tile_b is None:
        tile_b = _choose_tile_b(B)
    grid = (pl.cdiv(B, tile_b),)

    weight_bytes = 4 * (w1.size + b1.size + w2p.size + b2p.size)
    cost = pl.CostEstimate(
        flops=2 * B * (S * H + H * a_pad),
        transcendentals=B * a_pad,
        bytes_accessed=4 * (B * S + B * a_pad) + weight_bytes,
    )

    out = pl.pallas_call(
        actor_kernel,
        out_shape=jax.ShapeDtypeStruct((B, a_pad), jnp.float32),
        grid_spec=pltpu.PrefetchScalarGridSpec(
            num_scalar_prefetch=0,
            grid=grid,
            in_specs=[
                pl.BlockSpec((tile_b, S), lambda i: (i, 0)),   # x tiles stream
                pl.BlockSpec((S, H), lambda i: (0, 0)),        # weights stay VMEM-resident
                pl.BlockSpec((1, H), lambda i: (0, 0)),
                pl.BlockSpec((H, a_pad), lambda i: (0, 0)),
                pl.BlockSpec((1, a_pad), lambda i: (0, 0)),
            ],
            out_specs=pl.BlockSpec((tile_b, a_pad), lambda i: (i, 0)),
        ),
        compiler_params=pltpu.CompilerParams(
            dimension_semantics=("parallel",),   # megacore split on v7x
        ),
        cost_estimate=cost,
    )(x, w1, b1, w2p, b2p)

    # Column slice back to the real action dim (consumers that can read the
    # padded (B, a_pad) buffer directly should do so and skip this pass).
    return out[:, :action_dim]


def init_actor_params(key, state_dim, action_dim, hidden=128):
    # torch.nn.Linear default init: U(-1/sqrt(fan_in), 1/sqrt(fan_in)).
    k1, k2, k3, k4 = jax.random.split(key, 4)
    bound1 = 1.0 / jnp.sqrt(state_dim)
    bound2 = 1.0 / jnp.sqrt(hidden)
    w1 = jax.random.uniform(k1, (state_dim, hidden), jnp.float32, -bound1, bound1)
    b1 = jax.random.uniform(k2, (1, hidden), jnp.float32, -bound1, bound1)
    w2 = jax.random.uniform(k3, (hidden, action_dim), jnp.float32, -bound2, bound2)
    b2 = jax.random.uniform(k4, (1, action_dim), jnp.float32, -bound2, bound2)
    return w1, b1, w2, b2


if __name__ == "__main__":
    key = jax.random.PRNGKey(0)
    state_dim, action_dim, batch = 16, 8, 64   # small; tile_b -> 32, grid -> 2 steps

    pkey, xkey = jax.random.split(key)
    w1, b1, w2, b2 = init_actor_params(pkey, state_dim, action_dim)
    params = prepare_actor_params(w1, b1, w2, b2)   # one-time padding, outside the hot path
    x = jax.random.normal(xkey, (batch, state_dim), jnp.float32)

    out = actor_forward(x, params)
    out = jax.block_until_ready(out)

    # Pure-JAX reference.
    ref = jax.nn.softmax(jnp.maximum(x @ w1 + b1, 0.0) @ w2 + b2, axis=-1)
    assert out.shape == (batch, action_dim)
    assert jnp.allclose(jnp.sum(out, axis=-1), 1.0, atol=1e-4)
    assert jnp.allclose(out, ref, atol=1e-3)

    print("KERNEL_OK")
</pallas_src>

<mosaic_0001>
module attributes {stable_mosaic.version = 11 : i64} {
  func.func @actor_kernel(%arg0: i32, %arg1: memref<32x16xf32, #tpu.memory_space<vmem>>, %arg2: memref<16x128xf32, #tpu.memory_space<vmem>>, %arg3: memref<1x128xf32, #tpu.memory_space<vmem>>, %arg4: memref<128x128xf32, #tpu.memory_space<vmem>>, %arg5: memref<1x128xf32, #tpu.memory_space<vmem>>, %arg6: memref<32x128xf32, #tpu.memory_space<vmem>>) attributes {dimension_semantics = [#tpu.dimension_semantics<parallel>], iteration_bounds = array<i64: 2>, scalar_prefetch = 0 : i64, scratch_operands = 0 : i64, tpu.core_type = #tpu.core_type<tc>, window_params = [{transform_indices = @transform_0, window_bounds = array<i64: 32, 16>}, {pipeline_mode = #tpu.pipeline_mode<synchronous>, transform_indices = @transform_1, window_bounds = array<i64: 16, 128>}, {pipeline_mode = #tpu.pipeline_mode<synchronous>, transform_indices = @transform_2, window_bounds = array<i64: 1, 128>}, {pipeline_mode = #tpu.pipeline_mode<synchronous>, transform_indices = @transform_3, window_bounds = array<i64: 128, 128>}, {pipeline_mode = #tpu.pipeline_mode<synchronous>, transform_indices = @transform_4, window_bounds = array<i64: 1, 128>}, {transform_indices = @transform_5, window_bounds = array<i64: 32, 128>}]} {
    %c0 = arith.constant 0 : index
    %c0_0 = arith.constant 0 : index
    %0 = vector.load %arg1[%c0, %c0_0] : memref<32x16xf32, #tpu.memory_space<vmem>>, vector<32x16xf32>
    %c0_1 = arith.constant 0 : index
    %c0_2 = arith.constant 0 : index
    %1 = vector.load %arg2[%c0_1, %c0_2] : memref<16x128xf32, #tpu.memory_space<vmem>>, vector<16x128xf32>
    %cst = arith.constant dense<0.000000e+00> : vector<32x128xf32>
    %2 = tpu.matmul %0, %1, %cst {dimension_numbers = #tpu.dot_dimension_numbers<[1], [0], [0], [1], [0, 0, 1, 1], [], []>} : vector<32x16xf32>, vector<16x128xf32>, vector<32x128xf32> -> vector<32x128xf32>
    %c0_3 = arith.constant 0 : index
    %c0_4 = arith.constant 0 : index
    %3 = vector.load %arg3[%c0_3, %c0_4] : memref<1x128xf32, #tpu.memory_space<vmem>>, vector<1x128xf32>
    %4 = vector.broadcast %3 : vector<1x128xf32> to vector<32x128xf32>
    %5 = arith.addf %2, %4 : vector<32x128xf32>
    %cst_5 = arith.constant 0.000000e+00 : f32
    %6 = vector.broadcast %cst_5 : f32 to vector<32x128xf32>
    %7 = arith.maximumf %5, %6 : vector<32x128xf32>
    %c0_6 = arith.constant 0 : index
    %c0_7 = arith.constant 0 : index
    %8 = vector.load %arg4[%c0_6, %c0_7] : memref<128x128xf32, #tpu.memory_space<vmem>>, vector<128x128xf32>
    %cst_8 = arith.constant dense<0.000000e+00> : vector<32x128xf32>
    %9 = tpu.matmul %7, %8, %cst_8 {dimension_numbers = #tpu.dot_dimension_numbers<[1], [0], [0], [1], [0, 0, 1, 1], [], []>} : vector<32x128xf32>, vector<128x128xf32>, vector<32x128xf32> -> vector<32x128xf32>
    %c0_9 = arith.constant 0 : index
    %c0_10 = arith.constant 0 : index
    %10 = vector.load %arg5[%c0_9, %c0_10] : memref<1x128xf32, #tpu.memory_space<vmem>>, vector<1x128xf32>
    %11 = vector.broadcast %10 : vector<1x128xf32> to vector<32x128xf32>
    %12 = arith.addf %9, %11 : vector<32x128xf32>
    %cst_11 = arith.constant dense<0xFF800000> : vector<32xf32>
    %13 = vector.multi_reduction <maximumf>, %12, %cst_11 [1] : vector<32x128xf32> to vector<32xf32>
    %14 = vector.shape_cast %13 : vector<32xf32> to vector<32x1xf32>
    %15 = vector.broadcast %14 : vector<32x1xf32> to vector<32x128xf32>
    %16 = arith.subf %12, %15 : vector<32x128xf32>
    %17 = math.exp %16 : vector<32x128xf32>
    %cst_12 = arith.constant dense<0.000000e+00> : vector<32xf32>
    %18 = vector.multi_reduction <add>, %17, %cst_12 [1] : vector<32x128xf32> to vector<32xf32>
    %19 = vector.shape_cast %18 : vector<32xf32> to vector<32x1xf32>
    %cst_13 = arith.constant 1.000000e+00 : f32
    %20 = vector.broadcast %cst_13 : f32 to vector<32x1xf32>
    %21 = arith.divf %20, %19 : vector<32x1xf32>
    %22 = vector.broadcast %21 : vector<32x1xf32> to vector<32x128xf32>
    %23 = arith.mulf %17, %22 : vector<32x128xf32>
    %c0_14 = arith.constant 0 : index
    %c0_15 = arith.constant 0 : index
    %24 = vector.load %arg6[%c0_14, %c0_15] : memref<32x128xf32, #tpu.memory_space<vmem>>, vector<32x128xf32>
    tpu.vector_store %arg6[%c0_14, %c0_15], %23 {strides = array<i32>} : memref<32x128xf32, #tpu.memory_space<vmem>>, vector<32x128xf32>,
    return
  }
  func.func @transform_0(%arg0: i32) -> (i32, i32) {
    %c0_i32 = arith.constant 0 : i32
    %c0_i32_0 = arith.constant 0 : i32
    return %arg0, %c0_i32 : i32, i32
  }
  func.func @transform_1(%arg0: i32) -> (i32, i32) {
    %c0_i32 = arith.constant 0 : i32
    %c0_i32_0 = arith.constant 0 : i32
    %c0_i32_1 = arith.constant 0 : i32
    return %c0_i32, %c0_i32_0 : i32, i32
  }
  func.func @transform_2(%arg0: i32) -> (i32, i32) {
    %c0_i32 = arith.constant 0 : i32
    %c0_i32_0 = arith.constant 0 : i32
    %c0_i32_1 = arith.constant 0 : i32
    return %c0_i32, %c0_i32_0 : i32, i32
  }
  func.func @transform_3(%arg0: i32) -> (i32, i32) {
    %c0_i32 = arith.constant 0 : i32
    %c0_i32_0 = arith.constant 0 : i32
    %c0_i32_1 = arith.constant 0 : i32
    return %c0_i32, %c0_i32_0 : i32, i32
  }
  func.func @transform_4(%arg0: i32) -> (i32, i32) {
    %c0_i32 = arith.constant 0 : i32
    %c0_i32_0 = arith.constant 0 : i32
    %c0_i32_1 = arith.constant 0 : i32
    return %c0_i32, %c0_i32_0 : i32, i32
  }
  func.func @transform_5(%arg0: i32) -> (i32, i32) {
    %c0_i32 = arith.constant 0 : i32
    %c0_i32_0 = arith.constant 0 : i32
    return %arg0, %c0_i32 : i32, i32
  }
}

</mosaic_0001>

<bundles_post_ra>
// kernel: tpu_custom_call.1
= control target key start
LH: loop header
LB: loop body
LE: loop exit
PB: predicated region body
PF: predicated region fallthrough
CT: control target
= control target key end

     0   :  { %10 = vsyncpa [#allocation3], 0  ;;  %s1082_s0 = inlined_call_operand.vmem [shape: f32[64,16], index: 0, kind: input, shape index: {}]   ;;  %s1083_s1 = inlined_call_operand.vmem [shape: f32[16,128], index: 1, kind: input, shape index: {}]   ;;  %s1084_s2 = inlined_call_operand.vmem [shape: f32[1,128], index: 2, kind: input, shape index: {}]   ;;  %s1085_s3 = inlined_call_operand.hbm [shape: f32[128,128], index: 3, kind: input, shape index: {}]   ;;  %s1086_s4 = inlined_call_operand.vmem [shape: f32[1,128], index: 4, kind: input, shape index: {}]   ;;  %s1087_s5 = inlined_call_operand.hbm [shape: f32[64,128], index: 5, kind: output, shape index: {}]  }
   0x1   :  { %11 = vsyncpa [#allocation4], 0 }
   0x2   :  { %13 = vsyncpa [#allocation4 + $0x1], 0  ;;  %s929_s18 = smov 0   ;;  %s931_s19 = smov 0  }
   0x3   :  { %s933_s20 = smov 0   ;;  %s935_s21 = smov 0  }
   0x4 LB: > { %s950_s22 = sadd.s32 4294967295, %s891_s21   ;;  %s596_s23 = sadd.s32 4294967294, %s891_s21   ;;  %s891_s21 = sphi %s935_s21, %s1103_s21   ;;  %s887_s20 = sphi %s933_s20, %s1102_s20   ;;  %s883_s19 = sphi %s931_s19, %s1101_s19   ;;  %s879_s18 = sphi %s929_s18, %s1100_s18  }
   0x5   : > { %s954_s24 = sadd.s32 1, %s891_s21   ;;  %s136_s25 = sadd.s32 1, %s887_s20 }
   0x6   : > { %s133_s26 = ssub.s32 %s891_s21, %s954_s24  ;;  %p146_p0 = scmp.ne.s32.totalorder %s887_s20, %s883_s19 }
   0x7   : > { %p134_p1 = scmp.eq.s32.totalorder %s133_s26, 0  ;;  %p147_p2 = scmp.eq.s32.totalorder %s950_s22, 1 }
   0x8   : > { %p152_p3 = scmp.ne.s32.totalorder %s883_s19, %s879_s18  ;;  %p153_p4 = scmp.eq.s32.totalorder %s596_s23, 1 }
   0x9   : > { %s965_s27 = scalar_select %p134_p1, %s887_s20, %s136_s25  }
   0xa   : > { %p967_p5 = por %p147_p2, %p146_p0  ;;  %p971_p6 = por %p153_p4, %p152_p3 }
   0xb   : > { %p597_p7 = scmp.ge.s32.totalorder %s891_s21, 1  ;;  %p160_p8 = scmp.lt.s32.totalorder %s891_s21, 3 }
   0xc   : > { %s1091_s28 = scalar_select %p967_p5, 1, 0 }
   0xd   : > { %s1092_s29 = scalar_select %p971_p6, 1, 0 }
   0xe   : > { %p1088_p9 = scmp.eq.s32.totalorder %s950_s22, 0  ;;  %p978_p10 = pnand %p597_p7, %p160_p8 }
   0xf   : > { %s893_s6 = smov [#allocation2]   ;;  %s797_s11 = scalar_lea.hbm %s1085_s3, 2048 }
  0x10   : > { %s1093_s30 = scalar_select %p978_p10, 1, 0 }
  0x11   : > { %s178_s7 = sshll.u32 %s893_s6, 4  ;;  %p733_p11 = pneg %p978_p10  ;;  %s179_s7 = int_to_ptr.vmem [resolvable:$true] %s178_s7 }
  0x12   : > { %p798_p13 = scmp.ne.s32.totalorder %s1085_s3, %s797_s11  ;;  %p804_p3 = scmp.lt.u32.totalorder %s797_s11, %s1085_s3 }
  0x13   : > { %p986_p12 = pnand %p1088_p9, %p733_p11 }
  0x15   : > { %p799_p0 = pneg %p986_p12 }
  0x17   : > { %p800_p1 = pnand %p799_p0, %p798_p13 }
  0x19   : > { %p801_p2 = pneg %p800_p1 }
  0x1b   : > { %p806_p4 = pnand %p804_p3, %p801_p2 }
  0x1d   : > { %809 = shalt.err (!%p806_p4)
}
  0x1e   : > { %s810_s16 = scalar_lea.vmem %s179_s7, 2048  ;;  %p818_p9 = scmp.lt.s32.totalorder %s179_s7, %s179_s7 }
  0x1f   : > { %p811_p7 = scmp.ne.s32.totalorder %s179_s7, %s810_s16  ;;  %p819_p6 = scmp.lt.s32.totalorder %s810_s16, %s810_s16 }
  0x21   : > { %p813_p8 = pnand %p811_p7, %p799_p0  ;;  %p820_p5 = por %p819_p6, %p818_p9 }
  0x23   : > { %p814_p11 = pneg %p813_p8 }
  0x25   : > { %p821_p10 = pnand %p820_p5, %p814_p11 }
  0x27   : > { %824 = shalt.err (!%p821_p10)
}
  0x28   : > { %s894_s17 = smov 128   ;;  %s895_s23 = smov 8  }
  0x29   : > { %736 = dma.hbm_to_vmem [thread:$0]  (!%p986_p12), %s1085_s3, 2048, %s179_s7, [#allocation3], %s894_s17, %s894_s17, %s895_s23  }
  0x2a   : > { %p1095_p13 = scmp.ne.s32.totalorder %s1093_s30, 0 }
  0x2b   : > { %p1096_p1 = scmp.eq.s32.totalorder (!%p1095_p13), %s950_s22, 0 }
  0x2c   : > { %206 = sbr.rel (%p1095_p13) target bundleno = 829 (0x33d), region = 40 }
  0x33   : > { %870 = dma.done.wait (%p1096_p1), [#allocation3], 2048   ;;  %p1097_p0 = pmov %p1096_p1 }
  0x34   : > { %s603_s6 = sshll.u32 %s950_s22, 2  ;;  %vm254_vm0 = vcmask 130048   ;;  %v245_v0 = vld [vmem:[%s1083_s1] sm:$0xff]  ;;  %v246_v1 = vld [vmem:[%s1083_s1 + $0x8] sm:$0xff]  ;;  %v358_v6 = vld [vmem:[#allocation2 + $0x10] sm:$0xff]  ;;  %s231_s23 = sand.u32 1, %s883_s19  }
  0x35   : > { %872 = vsyncadd (%p1097_p0), [#allocation3], 4294965248  ;;  %p235_p5 = scmp.lt.s32.totalorder %s603_s6, 7  ;;  %v691_v3 = vpack.c.bf16 %v246_v1, %v245_v0  ;;  %v356_v4 = vld [vmem:[#allocation2] sm:$0xff]  ;;  %v357_v5 = vld [vmem:[#allocation2 + $0x8] sm:$0xff]  ;;  %s602_s25 = sshll.u32 %s231_s23, 5 }
  0x36   : > { %v695_v7 = vpack.c.bf16 %v357_v5, %v356_v4  ;;  %v359_v8 = vld [vmem:[#allocation2 + $0x18] sm:$0xff]  ;;  %v360_v11 = vld [vmem:[#allocation2 + $0x20] sm:$0xff]  ;;  %v361_v12 = vld [vmem:[#allocation2 + $0x28] sm:$0xff]  ;;  %s233_s26 = scalar_lea.vmem [#allocation5], %s602_s25  ;;  %s1041_s7 = scalar_lea.sflag [#allocation4], %s231_s23 }
  0x37   : > { %s1105_s6 = smov (!%p235_p5, %s603_s6), 7  ;;  %692 = vmatprep.subr.bf16.mxu0 %v691_v3  ;;  %v699_v10 = vpack.c.bf16 %v359_v8, %v358_v6  ;;  %v703_v14 = vpack.c.bf16 %v361_v12, %v360_v11  ;;  %v362_v16 = vld [vmem:[#allocation2 + $0x30] sm:$0xff]  ;;  %v363_v17 = vld [vmem:[#allocation2 + $0x38] sm:$0xff]  ;;  %v364_v19 = vld [vmem:[#allocation2 + $0x40] sm:$0xff]  ;;  %p1098_p9 = scmp.ne.s32.totalorder %s1091_s28, 0 }
  0x38   : > { %s604_s9 = sshll.u32 %s1105_s6, 3  ;;  %694 = vmatpush3.bf16.msra.mxu0 %v691_v3  ;;  %696 = vmatprep.subr.bf16.mxu1 %v695_v7  ;;  %v707_v18 = vpack.c.bf16 %v363_v17, %v362_v16  ;;  %v365_v20 = vld [vmem:[#allocation2 + $0x48] sm:$0xff]  ;;  %v366_v22 = vld [vmem:[#allocation2 + $0x50] sm:$0xff]  ;;  %v367_v23 = vld [vmem:[#allocation2 + $0x58] sm:$0xff]  ;;  %s616_s6 = sshll.u32 %s950_s22, 9 }
  0x39   : > { %s238_s11 = scalar_lea.vmem %s1082_s0, %s604_s9  ;;  %698 = vmatpush3.bf16.msra.mxu1 %v695_v7  ;;  %v711_v21 = vpack.c.bf16 %v365_v20, %v364_v19  ;;  %v715_v24 = vpack.c.bf16 %v367_v23, %v366_v22  ;;  %v368_v25 = vld [vmem:[#allocation2 + $0x60] sm:$0xff]  ;;  %v369_v26 = vld [vmem:[#allocation2 + $0x68] sm:$0xff]  ;;  %v370_v28 = vld [vmem:[#allocation2 + $0x70] sm:$0xff]  ;;  %s522_s9 = sshll.u32 %s233_s26, 4  ;;  %s1039_s9 = int_to_ptr.vmem [resolvable:$true] %s522_s9 }
  0x3a   : > { %v241_v2 = vld [vmem:[%s238_s11] sm:$0xff]  ;;  %v242_v9 = vld [vmem:[%s238_s11 + $0x8] sm:$0xff]  ;;  %v243_v13 = vld [vmem:[%s238_s11 + $0x10] sm:$0xff]  ;;  %700 = vmatprep.subr.bf16.mxu1 %v699_v10  ;;  %v719_v27 = vpack.c.bf16 %v369_v26, %v368_v25  ;;  %s825_s12 = scalar_lea.vmem %s1039_s9, 512  ;;  %s896_s22 = smov [#allocation5]  }
  0x3b   : > { %647 = vmatprep.mubr.msk.f32.mxu0 %vm254_vm0, %v241_v2  ;;  %v244_v15 = vld [vmem:[%s238_s11 + $0x18] sm:$0xff]  ;;  %v605_v31 = vld [vmem:[%s1084_s2] ss:$0 sm:$0xff]  ;;  %s1037_s11 = scalar_lea.hbm %s1087_s5, %s616_s6  ;;  %p826_p6 = scmp.ne.s32.totalorder %s1039_s9, %s825_s12 }
  0x3c   : > { %648 = vmatmul.mubr.msk.f32.vlgmr.msra.gmra.mrb[0].mxu0 %vm254_vm0, %v242_v9  ;;  %v371_v29 = vld [vmem:[#allocation2 + $0x78] sm:$0xff]  ;;  %v610_v44 = vld [vmem:[%s1086_s4] ss:$0 sm:$0xff]  ;;  %s829_s30 = sshll.u32 %s896_s22, 4  ;;  %s830_s30 = int_to_ptr.vmem [resolvable:$false] %s829_s30 }
  0x3d   : > { %650 = vmatprep.mubr.msk.f32.mxu0 %vm254_vm0, %v243_v13  ;;  %702 = vmatpush3.bf16.msra.mxu1 %v699_v10  ;;  %v723_v30 = vpack.c.bf16 %v371_v29, %v370_v28  ;;  %p827_p10 = pnand %p826_p6, %p1098_p9  ;;  %s831_s13 = scalar_lea.vmem %s830_s30, 1024 }
  0x3e   : > { %704 = vmatprep.subr.bf16.mxu1 %v703_v14  ;;  %p832_p2 = scmp.lt.s32.totalorder %s1039_s9, %s830_s30  ;;  %p833_p3 = scmp.lt.s32.totalorder %s831_s13, %s825_s12 }
  0x3f   : > { %p828_p12 = pneg %p827_p10 }
  0x40   : > { %651 = vmatmul.mubr.msk.f32.gmra.mrb[2].mxu0 %vm254_vm0, %v244_v15  ;;  %p834_p4 = por %p833_p3, %p832_p2 }
  0x41   : > { %706 = vmatpush3.bf16.msra.mxu1 %v703_v14 }
  0x42   : > { %708 = vmatprep.subr.bf16.mxu1 %v707_v18  ;;  %p835_p7 = pnand %p834_p4, %p828_p12 }
  0x45   : > { %710 = vmatpush3.bf16.msra.mxu1 %v707_v18 }
  0x46   : > { %712 = vmatprep.subr.bf16.mxu1 %v711_v21 }
  0x49   : > { %714 = vmatpush3.bf16.msra.mxu1 %v711_v21 }
  0x4a   : > { %716 = vmatprep.subr.bf16.mxu1 %v715_v24 }
  0x4d   : > { %718 = vmatpush3.bf16.msra.mxu1 %v715_v24 }
  0x4e   : > { %720 = vmatprep.subr.bf16.mxu1 %v719_v27 }
  0x51   : > { %722 = vmatpush3.bf16.msra.mxu1 %v719_v27 }
  0x52   : > { %724 = vmatprep.subr.bf16.mxu1 %v723_v30 }
  0x55   : > { %726 = vmatpush3.bf16.msra.mxu1 %v723_v30 }
 0x10f   : > { %v649_v32 = vpop.f32.mrb[0].mxu0 }
 0x110   : > { %v339_v33 = vadd.f32 %v649_v32, %v605_v31  ;;  %v333_v34 = vpop.f32.mrb[1].mxu0 }
 0x111   : > { %v334_v35 = vadd.f32 %v605_v31, %v333_v34 }
 0x112   : > { %v353_v38 = vmax.f32 %v339_v33, 0.0 }
 0x113   : > { %v652_v36 = vpop.f32.mrb[2].mxu0  ;;  %v352_v37 = vmax.f32 %v334_v35, 0.0 }
 0x114   : > { %v349_v39 = vadd.f32 %v652_v36, %v605_v31  ;;  %v343_v40 = vpop.f32.mrb[3].mxu0 }
 0x115   : > { %v344_v41 = vadd.f32 %v605_v31, %v343_v40  ;;  %685 = vmatprep.mubr.f32.mxu1 %v352_v37 }
 0x116   : > { %686 = vmatmul.mubr.f32.vlgmr.msra.gmra.mrb[0].mxu1 %v353_v38  ;;  %v355_v43 = vmax.f32 %v349_v39, 0.0 }
 0x117   : > { %v354_v42 = vmax.f32 %v344_v41, 0.0 }
 0x119   : > { %688 = vmatprep.mubr.f32.mxu1 %v354_v42 }
 0x11a   : > { %689 = vmatmul.mubr.f32.gmra.mrb[2].mxu1 %v355_v43 }
 0x1e9   : > { %v687_v45 = vpop.f32.mrb[0].mxu1 }
 0x1ea   : > { %v445_v46 = vpop.f32.mrb[1].mxu1  ;;  %v451_v50 = vadd.f32 %v687_v45, %v610_v44 }
 0x1eb   : > { %v446_v47 = vadd.f32 %v610_v44, %v445_v46 }
 0x1ed   : > { %v690_v48 = vpop.f32.mrb[2].mxu1  ;;  %464 = vmax.xlane.f32.xlu0 %v446_v47 }
 0x1ee   : > { %v455_v49 = vpop.f32.mrb[3].mxu1  ;;  %v461_v52 = vadd.f32 %v690_v48, %v610_v44 }
 0x1ef   : > { %v456_v51 = vadd.f32 %v610_v44, %v455_v49 }
 0x1f1   : > { %468 = vmax.xlane.f32.xlu1 %v456_v51  ;;  %466 = vmax.xlane.f32.xlu0 %v451_v50 }
 0x1f5   : > { %470 = vmax.xlane.f32.xlu1 %v461_v52 }
 0x27a   : > { %v465_v53 = vpop.xlane.xlu0 %464 }
 0x27b   : > { %v472_v54 = vsub.f32 %v446_v47, %v465_v53 }
 0x27d   : > { %v476_v55 = vmul.f32 1.442695, %v472_v54 }
 0x27e   : > { %v469_v56 = vpop.xlane.xlu1 %468  ;;  %v467_v57 = vpop.xlane.xlu0 %466 }
 0x27f   : > { %781 = vpow2.f32 %v476_v55  ;;  %v474_v58 = vsub.f32 %v456_v51, %v469_v56  ;;  %v473_v59 = vsub.f32 %v451_v50, %v467_v57 }
 0x281   : > { %v480_v60 = vmul.f32 1.442695, %v474_v58  ;;  %v478_v61 = vmul.f32 1.442695, %v473_v59 }
 0x282   : > { %v471_v62 = vpop.xlane.xlu1 %470 }
 0x283   : > { %783 = vpow2.f32 %v480_v60  ;;  %v475_v63 = vsub.f32 %v461_v52, %v471_v62 }
 0x284   : > { %785 = vpow2.f32 %v478_v61 }
 0x285   : > { %v482_v0 = vmul.f32 1.442695, %v475_v63 }
 0x287   : > { %787 = vpow2.f32 %v482_v0 }
 0x289   : > { %v782_v1 = vpop.eup %781 }
 0x28a   : > { %484 = vadd.xlane.f32.xlu0 %v782_v1 }
 0x28d   : > { %v784_v2 = vpop.eup %783 }
 0x28e   : > { %v786_v3 = vpop.eup %785  ;;  %488 = vadd.xlane.f32.xlu0 %v784_v2 }
 0x28f   : > { %486 = vadd.xlane.f32.xlu1 %v786_v3 }
 0x291   : > { %v788_v4 = vpop.eup %787 }
 0x293   : > { %490 = vadd.xlane.f32.xlu1 %v788_v4 }
 0x317   : > { %v485_v5 = vpop.xlane.xlu0 %484 }
 0x318   : > { %789 = vrcp.f32 %v485_v5 }
 0x31b   : > { %v489_v6 = vpop.xlane.xlu0 %488 }
 0x31c   : > { %v487_v7 = vpop.xlane.xlu1 %486  ;;  %791 = vrcp.f32 %v489_v6 }
 0x31d   : > { %793 = vrcp.f32 %v487_v7 }
 0x320   : > { %v491_v8 = vpop.xlane.xlu1 %490 }
 0x321   : > { %795 = vrcp.f32 %v491_v8 }
 0x322   : > { %v790_v9 = vpop.eup %789 }
 0x323   : > { %v500_v10 = vmul.f32 %v790_v9, %v782_v1 }
 0x325   : > { %504 = vst [vmem:[%s233_s26] sm:$0xff] %v500_v10 }
 0x326   : > { %v792_v11 = vpop.eup %791 }
 0x327   : > { %v794_v12 = vpop.eup %793  ;;  %v502_v13 = vmul.f32 %v792_v11, %v784_v2 }
 0x328   : > { %v501_v14 = vmul.f32 %v794_v12, %v786_v3 }
 0x329   : > { %506 = vst [vmem:[%s233_s26 + $0x10] sm:$0xff] %v502_v13 }
 0x32a   : > { %505 = vst [vmem:[%s233_s26 + $0x8] sm:$0xff] %v501_v14 }
 0x32b   : > { %v796_v15 = vpop.eup %795 }
 0x32c   : > { %v503_v16 = vmul.f32 %v796_v15, %v788_v4 }
 0x32e   : > { %507 = vst [vmem:[%s233_s26 + $0x18] sm:$0xff] %v503_v16 }
 0x32f   : > { %838 = shalt.err (!%p835_p7)
}
 0x330   : > { %s839_s14 = scalar_lea.hbm %s1037_s11, 512  ;;  %s843_s17 = scalar_lea.hbm %s1087_s5, 1024 }
 0x331   : > { %p840_p8 = scmp.ne.s32.totalorder %s1037_s11, %s839_s14  ;;  %p844_p1 = scmp.lt.u32.totalorder %s1037_s11, %s1087_s5 }
 0x332   : > { %p845_p0 = scmp.lt.u32.totalorder %s843_s17, %s839_s14  ;;  %p847_p6 = scmp.lt.u32.totalorder %s839_s14, %s1037_s11 }
 0x333   : > { %p841_p11 = pnand %p840_p8, %p1098_p9 }
 0x334   : > { %p846_p5 = por %p845_p0, %p844_p1 }
 0x335   : > { %p842_p13 = pneg %p841_p11 }
 0x336   : > { %p848_p10 = por %p847_p6, %p846_p5 }
 0x338   : > { %p849_p12 = pnand %p848_p10, %p842_p13 }
 0x33a   : > { %852 = shalt.err (!%p849_p12)
}
 0x33b   : > { %s897_s26 = smov 128   ;;  %s898_s6 = smov 8  }
 0x33c   : > { %731 = dma.vmem_to_hbm [thread:$0]  (%p1098_p9), %s1039_s9, 512, %s1037_s11, %s1041_s7, %s897_s26, %s897_s26, %s898_s6  }
 0x33d PF: > { %p743_p2 = scmp.ge.s32.totalorder %s891_s21, 2  ;;  %s537_s8 = sand.u32 1, %s879_s18  }
 0x33e   : > { %p1099_p3 = scmp.ne.s32.totalorder %s1092_s29, 0  ;;  %s538_s10 = scalar_lea.sflag [#allocation4], %s537_s8 }
 0x340   : > { %p738_p4 = pnand %p743_p2, %p1099_p3 }
 0x342   : > { %874 = dma.done.wait (!%p738_p4), %s538_s10, 512  }
 0x343   : > { %876 = vsyncadd (!%p738_p4), %s538_s10, 4294966784  ;;  %p16_p7 = scmp.ge.s32.totalorder %s954_s24, 4   ;;  %s1100_s18 = smov %s883_s19 }
 0x344   : > { %s1101_s19 = smov %s887_s20  ;;  %s1102_s20 = smov %s965_s27 }
 0x345   : > { %s1103_s21 = smov %s954_s24  ;;  %18 = sbr.rel (!%p16_p7) target bundleno = 4 (0x4), region = 80 }
 0x34c   :  { %543 = vsyncpa [#allocation3], 1 }
 0x34d   :  { %545 = vsyncpa [#allocation3 + $0x1], 1 }
 0x34e   :  { %546 = vsyncpa [#allocation4], 1 }
 0x34f   :  { %548 = vsyncpa [#allocation4 + $0x1], 1 }

</bundles_post_ra>
